<compile_context>
chip_gen: v5e
topology: v5e:2x2
jax: 0.10.0
libtpu: 0.0.40
codegen_flags: <defaults>
</compile_context>

<pallas_src>
import functools

import jax
import jax.numpy as jnp
from jax import lax
from jax.experimental import pallas as pl
from jax.experimental.pallas import tpu as pltpu


# ---------------------------------------------------------------------------
# Fused bidirectional-GRU kernel: one invocation, fully VMEM-resident.
# Column layout (width 6H): [ r_f | r_b | z_f | z_b | n_f | n_b ]
# Packed hidden state (width 2H): [ h_f | h_b ]
# ---------------------------------------------------------------------------
def _bigru_fused_kernel(xp_ref, wih_ref, bih_ref, whh_ref, bhhn_ref,
                        out_ref, hid_ref, *, T, Bp, H):
    H2, H4, H6 = 2 * H, 4 * H, 6 * H

    # Hoisted input projection: ONE MXU matmul covering every timestep and
    # both directions.  xp rows are [x(t) | x(T-1-t)] and wih is
    # block-structured, so the backward gate columns already see the
    # time-reversed input -> the result is step-aligned.  r/z halves of b_hh
    # are pre-folded into bih.
    gi = jnp.dot(xp_ref[...], wih_ref[...],
                 preferred_element_type=jnp.float32) + bih_ref[...]   # (T*Bp, 6H)

    whh = whh_ref[...]                                                # (2H, 6H)
    # Hoisted bias broadcast: materialize the (Bp, 2H) slab once so the
    # unrolled loop contains no broadcast_in_dim / bias re-load.
    bhh_n = jnp.broadcast_to(bhhn_ref[...], (Bp, H2))

    h_cat = jnp.zeros((Bp, H2), jnp.float32)      # [h_fwd | h_bwd]
    h_hist = [None] * T

    # Static, fully-unrolled time loop (short T): forward direction processes
    # time s, backward direction processes time T-1-s, both in one pass.
    for s in range(T):
        gi_s = gi[s * Bp:(s + 1) * Bp, :]                      # (Bp, 6H), tile-aligned
        # Single recurrent matmul per step for BOTH directions (block-diag whh).
        gh = jnp.dot(h_cat, whh, preferred_element_type=jnp.float32)  # (Bp, 6H)

        rz = jax.nn.sigmoid(gi_s[:, 0:H4] + gh[:, 0:H4])       # one sigmoid, (Bp, 4H)
        r = rz[:, 0:H2]
        z = rz[:, H2:H4]
        n = jnp.tanh(gi_s[:, H4:H6] + r * (gh[:, H4:H6] + bhh_n))     # one tanh, (Bp, 2H)
        h_cat = (1.0 - z) * n + z * h_cat                      # already [h_f | h_b]
        h_hist[s] = h_cat

    # Fused fwd(t) + bwd(t) sum in registers -> ONE contiguous (T, Bp, H) store.
    out_f = jnp.stack([h_hist[t][:, 0:H] for t in range(T)], axis=0)
    out_b = jnp.stack([h_hist[T - 1 - t][:, H:H2] for t in range(T)], axis=0)
    out_ref[...] = out_f + out_b

    # Final hidden state ([fwd, bwd]), written exactly once.
    h_last = h_hist[T - 1]
    hid_ref[...] = jnp.stack([h_last[:, 0:H], h_last[:, H:H2]], axis=0)


def bigru_pallas(x, packed, *, hidden_size):
    """x: (T, B, D) f32 time-major.  Returns (out (T,B,H), hidden (2,B,H))."""
    T, B, D = x.shape
    H = hidden_size
    Bp = ((B + 7) // 8) * 8               # pad batch to the f32 sublane tile
    wih, bih, whh, bhhn = packed

    if Bp != B:
        x = jnp.pad(x, ((0, 0), (0, Bp - B), (0, 0)))
    # Forward-time and reverse-time inputs side by side; with the
    # block-structured input weight this yields a step-aligned projection.
    x_pair = jnp.concatenate([x, x[::-1]], axis=-1).reshape(T * Bp, 2 * D)

    vmem = pl.BlockSpec(memory_space=pltpu.MemorySpace.VMEM)
    kernel = functools.partial(_bigru_fused_kernel, T=T, Bp=Bp, H=H)
    out, hid = pl.pallas_call(
        kernel,
        out_shape=(jax.ShapeDtypeStruct((T, Bp, H), jnp.float32),
                   jax.ShapeDtypeStruct((2, Bp, H), jnp.float32)),
        in_specs=[vmem] * 5,
        out_specs=(vmem, vmem),
    )(x_pair, wih, bih, whh, bhhn)
    # Strip batch padding outside the kernel (cheap XLA slices).
    return out[:, :B, :], hid[:, :B, :]


# ---------------------------------------------------------------------------
# Weight packing (done once, outside the kernel).
#   PyTorch layout: weight_ih (3H, D), weight_hh (3H, H), biases (3H,),
#   gate row order [r; z; n].  Packed column layout: [r_f r_b z_f z_b n_f n_b].
# ---------------------------------------------------------------------------
def pack_gru_params(w_ih_f, w_hh_f, b_ih_f, b_hh_f,
                    w_ih_b, w_hh_b, b_ih_b, b_hh_b, H):
    D = w_ih_f.shape[1]

    def wg(w, g):       # gate slab g (0=r,1=z,2=n) of a (3H, X) PyTorch weight
        return w[g * H:(g + 1) * H]

    def bg(b, g):
        return b[g * H:(g + 1) * H]

    # Input weight, block-structured over the paired [x(t) | x(T-1-t)] input:
    # rows [0:D] feed forward gate columns, rows [D:2D] feed backward columns.
    wih = jnp.zeros((2 * D, 6 * H), jnp.float32)
    whh = jnp.zeros((2 * H, 6 * H), jnp.float32)
    for g in range(3):
        cf, cb = (2 * g) * H, (2 * g + 1) * H
        wih = wih.at[0:D, cf:cf + H].set(wg(w_ih_f, g).T)
        wih = wih.at[D:2 * D, cb:cb + H].set(wg(w_ih_b, g).T)
        # Recurrent weight, block-structured over the packed [h_f | h_b] state.
        whh = whh.at[0:H, cf:cf + H].set(wg(w_hh_f, g).T)
        whh = whh.at[H:2 * H, cb:cb + H].set(wg(w_hh_b, g).T)

    # Input bias with the r/z halves of b_hh folded in; the n-gate recurrent
    # bias must stay inside r * (gh_n + b_hn), so it is kept separate.
    bih = jnp.concatenate([
        bg(b_ih_f, 0) + bg(b_hh_f, 0), bg(b_ih_b, 0) + bg(b_hh_b, 0),
        bg(b_ih_f, 1) + bg(b_hh_f, 1), bg(b_ih_b, 1) + bg(b_hh_b, 1),
        bg(b_ih_f, 2),                 bg(b_ih_b, 2)])[None, :]      # (1, 6H)
    bhhn = jnp.concatenate([bg(b_hh_f, 2), bg(b_hh_b, 2)])[None, :]  # (1, 2H)
    return wih, bih, whh, bhhn


# ---------------------------------------------------------------------------
# EncoderRNN forward (glue in plain JAX).
# ---------------------------------------------------------------------------
def encoder_rnn_forward(in_text, emb_table, packed, hidden_size):
    """in_text: (B, T) int32 ids.  Returns (outputs (T,B,H), hidden (2,B,H))."""
    # text_encoder stub: embedding lookup -> (B, T, word_latent_dim)
    text_feat_seq = emb_table[in_text]                    # (B, T, D)
    x = jnp.transpose(text_feat_seq, (1, 0, 2))           # .transpose(0,1) -> (T, B, D)
    return bigru_pallas(x, packed, hidden_size=hidden_size)


# ---------------------------------------------------------------------------
# Pure-JAX reference (lax.scan) for correctness checking.
# ---------------------------------------------------------------------------
def _ref_gru_cell(x, h, wi_t, wh_t, bi, bh, H):
    gi = x @ wi_t + bi
    gh = h @ wh_t + bh
    r = jax.nn.sigmoid(gi[:, 0:H] + gh[:, 0:H])
    z = jax.nn.sigmoid(gi[:, H:2 * H] + gh[:, H:2 * H])
    n = jnp.tanh(gi[:, 2 * H:3 * H] + r * gh[:, 2 * H:3 * H])
    return (1.0 - z) * n + z * h


def _ref_gru_dir(x, wi_t, wh_t, bi, bh, H, reverse):
    B = x.shape[1]
    h0 = jnp.zeros((B, H), jnp.float32)

    def step(h, xt):
        h_new = _ref_gru_cell(xt, h, wi_t, wh_t, bi, bh, H)
        return h_new, h_new

    h_last, ys = lax.scan(step, h0, x, reverse=reverse)
    return ys, h_last


def encoder_rnn_reference(in_text, emb_table, raw_params, hidden_size):
    (w_ih_f, w_hh_f, b_ih_f, b_hh_f, w_ih_b, w_hh_b, b_ih_b, b_hh_b) = raw_params
    H = hidden_size
    feats = emb_table[in_text]
    x = jnp.transpose(feats, (1, 0, 2))
    out_f, h_f = _ref_gru_dir(x, w_ih_f.T, w_hh_f.T, b_ih_f, b_hh_f, H, reverse=False)
    out_b, h_b = _ref_gru_dir(x, w_ih_b.T, w_hh_b.T, b_ih_b, b_hh_b, H, reverse=True)
    outputs = out_f + out_b
    hidden = jnp.stack([h_f, h_b], axis=0)
    return outputs, hidden


# ---------------------------------------------------------------------------
if __name__ == "__main__":
    # Small shapes consistent with the module: word_latent_dim=32, hidden=32.
    B, T = 2, 8
    D = 32          # word_latent_dim
    H = 32          # hidden_size
    VOCAB = 100

    key = jax.random.PRNGKey(0)
    ks = jax.random.split(key, 12)
    bound = 1.0 / jnp.sqrt(jnp.float32(H))   # PyTorch nn.GRU default init range

    def u(k, shape):
        return jax.random.uniform(k, shape, jnp.float32, -bound, bound)

    # PyTorch layout: weight_ih (3H, D), weight_hh (3H, H), biases (3H,).
    w_ih_f, w_hh_f = u(ks[0], (3 * H, D)), u(ks[1], (3 * H, H))
    b_ih_f, b_hh_f = u(ks[2], (3 * H,)), u(ks[3], (3 * H,))
    w_ih_b, w_hh_b = u(ks[4], (3 * H, D)), u(ks[5], (3 * H, H))
    b_ih_b, b_hh_b = u(ks[6], (3 * H,)), u(ks[7], (3 * H,))

    packed = pack_gru_params(w_ih_f, w_hh_f, b_ih_f, b_hh_f,
                             w_ih_b, w_hh_b, b_ih_b, b_hh_b, H)

    emb_table = jax.random.normal(ks[8], (VOCAB, D), jnp.float32) * 0.1
    in_text = jax.random.randint(ks[9], (B, T), 0, VOCAB, jnp.int32)

    fwd = jax.jit(functools.partial(encoder_rnn_forward,
                                    emb_table=emb_table,
                                    packed=packed,
                                    hidden_size=H))
    outputs, hidden = fwd(in_text)
    jax.block_until_ready((outputs, hidden))

    ref_out, ref_hid = encoder_rnn_reference(
        in_text, emb_table,
        (w_ih_f, w_hh_f, b_ih_f, b_hh_f, w_ih_b, w_hh_b, b_ih_b, b_hh_b), H)

    assert outputs.shape == (T, B, H), outputs.shape
    assert hidden.shape == (2, B, H), hidden.shape
    assert jnp.allclose(outputs, ref_out, atol=1e-5, rtol=1e-5)
    assert jnp.allclose(hidden, ref_hid, atol=1e-5, rtol=1e-5)

    print("KERNEL_OK")
</pallas_src>

<mosaic_0001>
module attributes {stable_mosaic.version = 11 : i64} {
  func.func @_bigru_fused_kernel(%arg0: memref<64x64xf32, #tpu.memory_space<vmem>>, %arg1: memref<64x192xf32, #tpu.memory_space<vmem>>, %arg2: memref<1x192xf32, #tpu.memory_space<vmem>>, %arg3: memref<64x192xf32, #tpu.memory_space<vmem>>, %arg4: memref<1x64xf32, #tpu.memory_space<vmem>>, %arg5: memref<8x8x32xf32, #tpu.memory_space<vmem>>, %arg6: memref<2x8x32xf32, #tpu.memory_space<vmem>>) attributes {dimension_semantics = [], scalar_prefetch = 0 : i64, scratch_operands = 0 : i64, tpu.core_type = #tpu.core_type<tc>} {
    %c0 = arith.constant 0 : index
    %c0_0 = arith.constant 0 : index
    %0 = vector.load %arg0[%c0, %c0_0] : memref<64x64xf32, #tpu.memory_space<vmem>>, vector<64x64xf32>
    %c0_1 = arith.constant 0 : index
    %c0_2 = arith.constant 0 : index
    %1 = vector.load %arg1[%c0_1, %c0_2] : memref<64x192xf32, #tpu.memory_space<vmem>>, vector<64x192xf32>
    %cst = arith.constant dense<0.000000e+00> : vector<64x192xf32>
    %2 = tpu.matmul %0, %1, %cst {dimension_numbers = #tpu.dot_dimension_numbers<[1], [0], [0], [1], [0, 0, 1, 1], [], []>} : vector<64x64xf32>, vector<64x192xf32>, vector<64x192xf32> -> vector<64x192xf32>
    %c0_3 = arith.constant 0 : index
    %c0_4 = arith.constant 0 : index
    %3 = vector.load %arg2[%c0_3, %c0_4] : memref<1x192xf32, #tpu.memory_space<vmem>>, vector<1x192xf32>
    %4 = vector.broadcast %3 : vector<1x192xf32> to vector<64x192xf32>
    %5 = arith.addf %2, %4 : vector<64x192xf32>
    %c0_5 = arith.constant 0 : index
    %c0_6 = arith.constant 0 : index
    %6 = vector.load %arg3[%c0_5, %c0_6] : memref<64x192xf32, #tpu.memory_space<vmem>>, vector<64x192xf32>
    %c0_7 = arith.constant 0 : index
    %c0_8 = arith.constant 0 : index
    %7 = vector.load %arg4[%c0_7, %c0_8] : memref<1x64xf32, #tpu.memory_space<vmem>>, vector<1x64xf32>
    %8 = vector.shape_cast %7 : vector<1x64xf32> to vector<1x64xf32>
    %9 = vector.broadcast %8 : vector<1x64xf32> to vector<8x64xf32>
    %cst_9 = arith.constant 0.000000e+00 : f32
    %10 = vector.broadcast %cst_9 : f32 to vector<8x64xf32>
    %11 = vector.extract_strided_slice %5 {offsets = [0, 0], sizes = [8, 192], strides = [1, 1]} : vector<64x192xf32> to vector<8x192xf32>
    %cst_10 = arith.constant dense<0.000000e+00> : vector<8x192xf32>
    %12 = tpu.matmul %10, %6, %cst_10 {dimension_numbers = #tpu.dot_dimension_numbers<[1], [0], [0], [1], [0, 0, 1, 1], [], []>} : vector<8x64xf32>, vector<64x192xf32>, vector<8x192xf32> -> vector<8x192xf32>
    %13 = vector.extract_strided_slice %11 {offsets = [0, 0], sizes = [8, 128], strides = [1, 1]} : vector<8x192xf32> to vector<8x128xf32>
    %14 = vector.extract_strided_slice %12 {offsets = [0, 0], sizes = [8, 128], strides = [1, 1]} : vector<8x192xf32> to vector<8x128xf32>
    %15 = arith.addf %13, %14 : vector<8x128xf32>
    %16 = arith.negf %15 : vector<8x128xf32>
    %17 = math.exp %16 : vector<8x128xf32>
    %cst_11 = arith.constant 1.000000e+00 : f32
    %18 = vector.broadcast %cst_11 : f32 to vector<8x128xf32>
    %19 = arith.addf %18, %17 : vector<8x128xf32>
    %20 = arith.divf %18, %19 : vector<8x128xf32>
    %21 = vector.extract_strided_slice %20 {offsets = [0, 0], sizes = [8, 64], strides = [1, 1]} : vector<8x128xf32> to vector<8x64xf32>
    %22 = vector.extract_strided_slice %20 {offsets = [0, 64], sizes = [8, 64], strides = [1, 1]} : vector<8x128xf32> to vector<8x64xf32>
    %23 = vector.extract_strided_slice %11 {offsets = [0, 128], sizes = [8, 64], strides = [1, 1]} : vector<8x192xf32> to vector<8x64xf32>
    %24 = vector.extract_strided_slice %12 {offsets = [0, 128], sizes = [8, 64], strides = [1, 1]} : vector<8x192xf32> to vector<8x64xf32>
    %25 = arith.addf %24, %9 : vector<8x64xf32>
    %26 = arith.mulf %21, %25 : vector<8x64xf32>
    %27 = arith.addf %23, %26 : vector<8x64xf32>
    %28 = math.tanh %27 : vector<8x64xf32>
    %cst_12 = arith.constant 1.000000e+00 : f32
    %29 = vector.broadcast %cst_12 : f32 to vector<8x64xf32>
    %30 = arith.subf %29, %22 : vector<8x64xf32>
    %31 = arith.mulf %30, %28 : vector<8x64xf32>
    %32 = arith.mulf %22, %10 : vector<8x64xf32>
    %33 = arith.addf %31, %32 : vector<8x64xf32>
    %34 = vector.extract_strided_slice %5 {offsets = [8, 0], sizes = [8, 192], strides = [1, 1]} : vector<64x192xf32> to vector<8x192xf32>
    %cst_13 = arith.constant dense<0.000000e+00> : vector<8x192xf32>
    %35 = tpu.matmul %33, %6, %cst_13 {dimension_numbers = #tpu.dot_dimension_numbers<[1], [0], [0], [1], [0, 0, 1, 1], [], []>} : vector<8x64xf32>, vector<64x192xf32>, vector<8x192xf32> -> vector<8x192xf32>
    %36 = vector.extract_strided_slice %34 {offsets = [0, 0], sizes = [8, 128], strides = [1, 1]} : vector<8x192xf32> to vector<8x128xf32>
    %37 = vector.extract_strided_slice %35 {offsets = [0, 0], sizes = [8, 128], strides = [1, 1]} : vector<8x192xf32> to vector<8x128xf32>
    %38 = arith.addf %36, %37 : vector<8x128xf32>
    %39 = arith.negf %38 : vector<8x128xf32>
    %40 = math.exp %39 : vector<8x128xf32>
    %cst_14 = arith.constant 1.000000e+00 : f32
    %41 = vector.broadcast %cst_14 : f32 to vector<8x128xf32>
    %42 = arith.addf %41, %40 : vector<8x128xf32>
    %43 = arith.divf %41, %42 : vector<8x128xf32>
    %44 = vector.extract_strided_slice %43 {offsets = [0, 0], sizes = [8, 64], strides = [1, 1]} : vector<8x128xf32> to vector<8x64xf32>
    %45 = vector.extract_strided_slice %43 {offsets = [0, 64], sizes = [8, 64], strides = [1, 1]} : vector<8x128xf32> to vector<8x64xf32>
    %46 = vector.extract_strided_slice %34 {offsets = [0, 128], sizes = [8, 64], strides = [1, 1]} : vector<8x192xf32> to vector<8x64xf32>
    %47 = vector.extract_strided_slice %35 {offsets = [0, 128], sizes = [8, 64], strides = [1, 1]} : vector<8x192xf32> to vector<8x64xf32>
    %48 = arith.addf %47, %9 : vector<8x64xf32>
    %49 = arith.mulf %44, %48 : vector<8x64xf32>
    %50 = arith.addf %46, %49 : vector<8x64xf32>
    %51 = math.tanh %50 : vector<8x64xf32>
    %cst_15 = arith.constant 1.000000e+00 : f32
    %52 = vector.broadcast %cst_15 : f32 to vector<8x64xf32>
    %53 = arith.subf %52, %45 : vector<8x64xf32>
    %54 = arith.mulf %53, %51 : vector<8x64xf32>
    %55 = arith.mulf %45, %33 : vector<8x64xf32>
    %56 = arith.addf %54, %55 : vector<8x64xf32>
    %57 = vector.extract_strided_slice %5 {offsets = [16, 0], sizes = [8, 192], strides = [1, 1]} : vector<64x192xf32> to vector<8x192xf32>
    %cst_16 = arith.constant dense<0.000000e+00> : vector<8x192xf32>
    %58 = tpu.matmul %56, %6, %cst_16 {dimension_numbers = #tpu.dot_dimension_numbers<[1], [0], [0], [1], [0, 0, 1, 1], [], []>} : vector<8x64xf32>, vector<64x192xf32>, vector<8x192xf32> -> vector<8x192xf32>
    %59 = vector.extract_strided_slice %57 {offsets = [0, 0], sizes = [8, 128], strides = [1, 1]} : vector<8x192xf32> to vector<8x128xf32>
    %60 = vector.extract_strided_slice %58 {offsets = [0, 0], sizes = [8, 128], strides = [1, 1]} : vector<8x192xf32> to vector<8x128xf32>
    %61 = arith.addf %59, %60 : vector<8x128xf32>
    %62 = arith.negf %61 : vector<8x128xf32>
    %63 = math.exp %62 : vector<8x128xf32>
    %cst_17 = arith.constant 1.000000e+00 : f32
    %64 = vector.broadcast %cst_17 : f32 to vector<8x128xf32>
    %65 = arith.addf %64, %63 : vector<8x128xf32>
    %66 = arith.divf %64, %65 : vector<8x128xf32>
    %67 = vector.extract_strided_slice %66 {offsets = [0, 0], sizes = [8, 64], strides = [1, 1]} : vector<8x128xf32> to vector<8x64xf32>
    %68 = vector.extract_strided_slice %66 {offsets = [0, 64], sizes = [8, 64], strides = [1, 1]} : vector<8x128xf32> to vector<8x64xf32>
    %69 = vector.extract_strided_slice %57 {offsets = [0, 128], sizes = [8, 64], strides = [1, 1]} : vector<8x192xf32> to vector<8x64xf32>
    %70 = vector.extract_strided_slice %58 {offsets = [0, 128], sizes = [8, 64], strides = [1, 1]} : vector<8x192xf32> to vector<8x64xf32>
    %71 = arith.addf %70, %9 : vector<8x64xf32>
    %72 = arith.mulf %67, %71 : vector<8x64xf32>
    %73 = arith.addf %69, %72 : vector<8x64xf32>
    %74 = math.tanh %73 : vector<8x64xf32>
    %cst_18 = arith.constant 1.000000e+00 : f32
    %75 = vector.broadcast %cst_18 : f32 to vector<8x64xf32>
    %76 = arith.subf %75, %68 : vector<8x64xf32>
    %77 = arith.mulf %76, %74 : vector<8x64xf32>
    %78 = arith.mulf %68, %56 : vector<8x64xf32>
    %79 = arith.addf %77, %78 : vector<8x64xf32>
    %80 = vector.extract_strided_slice %5 {offsets = [24, 0], sizes = [8, 192], strides = [1, 1]} : vector<64x192xf32> to vector<8x192xf32>
    %cst_19 = arith.constant dense<0.000000e+00> : vector<8x192xf32>
    %81 = tpu.matmul %79, %6, %cst_19 {dimension_numbers = #tpu.dot_dimension_numbers<[1], [0], [0], [1], [0, 0, 1, 1], [], []>} : vector<8x64xf32>, vector<64x192xf32>, vector<8x192xf32> -> vector<8x192xf32>
    %82 = vector.extract_strided_slice %80 {offsets = [0, 0], sizes = [8, 128], strides = [1, 1]} : vector<8x192xf32> to vector<8x128xf32>
    %83 = vector.extract_strided_slice %81 {offsets = [0, 0], sizes = [8, 128], strides = [1, 1]} : vector<8x192xf32> to vector<8x128xf32>
    %84 = arith.addf %82, %83 : vector<8x128xf32>
    %85 = arith.negf %84 : vector<8x128xf32>
    %86 = math.exp %85 : vector<8x128xf32>
    %cst_20 = arith.constant 1.000000e+00 : f32
    %87 = vector.broadcast %cst_20 : f32 to vector<8x128xf32>
    %88 = arith.addf %87, %86 : vector<8x128xf32>
    %89 = arith.divf %87, %88 : vector<8x128xf32>
    %90 = vector.extract_strided_slice %89 {offsets = [0, 0], sizes = [8, 64], strides = [1, 1]} : vector<8x128xf32> to vector<8x64xf32>
    %91 = vector.extract_strided_slice %89 {offsets = [0, 64], sizes = [8, 64], strides = [1, 1]} : vector<8x128xf32> to vector<8x64xf32>
    %92 = vector.extract_strided_slice %80 {offsets = [0, 128], sizes = [8, 64], strides = [1, 1]} : vector<8x192xf32> to vector<8x64xf32>
    %93 = vector.extract_strided_slice %81 {offsets = [0, 128], sizes = [8, 64], strides = [1, 1]} : vector<8x192xf32> to vector<8x64xf32>
    %94 = arith.addf %93, %9 : vector<8x64xf32>
    %95 = arith.mulf %90, %94 : vector<8x64xf32>
    %96 = arith.addf %92, %95 : vector<8x64xf32>
    %97 = math.tanh %96 : vector<8x64xf32>
    %cst_21 = arith.constant 1.000000e+00 : f32
    %98 = vector.broadcast %cst_21 : f32 to vector<8x64xf32>
    %99 = arith.subf %98, %91 : vector<8x64xf32>
    %100 = arith.mulf %99, %97 : vector<8x64xf32>
    %101 = arith.mulf %91, %79 : vector<8x64xf32>
    %102 = arith.addf %100, %101 : vector<8x64xf32>
    %103 = vector.extract_strided_slice %5 {offsets = [32, 0], sizes = [8, 192], strides = [1, 1]} : vector<64x192xf32> to vector<8x192xf32>
    %cst_22 = arith.constant dense<0.000000e+00> : vector<8x192xf32>
    %104 = tpu.matmul %102, %6, %cst_22 {dimension_numbers = #tpu.dot_dimension_numbers<[1], [0], [0], [1], [0, 0, 1, 1], [], []>} : vector<8x64xf32>, vector<64x192xf32>, vector<8x192xf32> -> vector<8x192xf32>
    %105 = vector.extract_strided_slice %103 {offsets = [0, 0], sizes = [8, 128], strides = [1, 1]} : vector<8x192xf32> to vector<8x128xf32>
    %106 = vector.extract_strided_slice %104 {offsets = [0, 0], sizes = [8, 128], strides = [1, 1]} : vector<8x192xf32> to vector<8x128xf32>
    %107 = arith.addf %105, %106 : vector<8x128xf32>
    %108 = arith.negf %107 : vector<8x128xf32>
    %109 = math.exp %108 : vector<8x128xf32>
    %cst_23 = arith.constant 1.000000e+00 : f32
    %110 = vector.broadcast %cst_23 : f32 to vector<8x128xf32>
    %111 = arith.addf %110, %109 : vector<8x128xf32>
    %112 = arith.divf %110, %111 : vector<8x128xf32>
    %113 = vector.extract_strided_slice %112 {offsets = [0, 0], sizes = [8, 64], strides = [1, 1]} : vector<8x128xf32> to vector<8x64xf32>
    %114 = vector.extract_strided_slice %112 {offsets = [0, 64], sizes = [8, 64], strides = [1, 1]} : vector<8x128xf32> to vector<8x64xf32>
    %115 = vector.extract_strided_slice %103 {offsets = [0, 128], sizes = [8, 64], strides = [1, 1]} : vector<8x192xf32> to vector<8x64xf32>
    %116 = vector.extract_strided_slice %104 {offsets = [0, 128], sizes = [8, 64], strides = [1, 1]} : vector<8x192xf32> to vector<8x64xf32>
    %117 = arith.addf %116, %9 : vector<8x64xf32>
    %118 = arith.mulf %113, %117 : vector<8x64xf32>
    %119 = arith.addf %115, %118 : vector<8x64xf32>
    %120 = math.tanh %119 : vector<8x64xf32>
    %cst_24 = arith.constant 1.000000e+00 : f32
    %121 = vector.broadcast %cst_24 : f32 to vector<8x64xf32>
    %122 = arith.subf %121, %114 : vector<8x64xf32>
    %123 = arith.mulf %122, %120 : vector<8x64xf32>
    %124 = arith.mulf %114, %102 : vector<8x64xf32>
    %125 = arith.addf %123, %124 : vector<8x64xf32>
    %126 = vector.extract_strided_slice %5 {offsets = [40, 0], sizes = [8, 192], strides = [1, 1]} : vector<64x192xf32> to vector<8x192xf32>
    %cst_25 = arith.constant dense<0.000000e+00> : vector<8x192xf32>
    %127 = tpu.matmul %125, %6, %cst_25 {dimension_numbers = #tpu.dot_dimension_numbers<[1], [0], [0], [1], [0, 0, 1, 1], [], []>} : vector<8x64xf32>, vector<64x192xf32>, vector<8x192xf32> -> vector<8x192xf32>
    %128 = vector.extract_strided_slice %126 {offsets = [0, 0], sizes = [8, 128], strides = [1, 1]} : vector<8x192xf32> to vector<8x128xf32>
    %129 = vector.extract_strided_slice %127 {offsets = [0, 0], sizes = [8, 128], strides = [1, 1]} : vector<8x192xf32> to vector<8x128xf32>
    %130 = arith.addf %128, %129 : vector<8x128xf32>
    %131 = arith.negf %130 : vector<8x128xf32>
    %132 = math.exp %131 : vector<8x128xf32>
    %cst_26 = arith.constant 1.000000e+00 : f32
    %133 = vector.broadcast %cst_26 : f32 to vector<8x128xf32>
    %134 = arith.addf %133, %132 : vector<8x128xf32>
    %135 = arith.divf %133, %134 : vector<8x128xf32>
    %136 = vector.extract_strided_slice %135 {offsets = [0, 0], sizes = [8, 64], strides = [1, 1]} : vector<8x128xf32> to vector<8x64xf32>
    %137 = vector.extract_strided_slice %135 {offsets = [0, 64], sizes = [8, 64], strides = [1, 1]} : vector<8x128xf32> to vector<8x64xf32>
    %138 = vector.extract_strided_slice %126 {offsets = [0, 128], sizes = [8, 64], strides = [1, 1]} : vector<8x192xf32> to vector<8x64xf32>
    %139 = vector.extract_strided_slice %127 {offsets = [0, 128], sizes = [8, 64], strides = [1, 1]} : vector<8x192xf32> to vector<8x64xf32>
    %140 = arith.addf %139, %9 : vector<8x64xf32>
    %141 = arith.mulf %136, %140 : vector<8x64xf32>
    %142 = arith.addf %138, %141 : vector<8x64xf32>
    %143 = math.tanh %142 : vector<8x64xf32>
    %cst_27 = arith.constant 1.000000e+00 : f32
    %144 = vector.broadcast %cst_27 : f32 to vector<8x64xf32>
    %145 = arith.subf %144, %137 : vector<8x64xf32>
    %146 = arith.mulf %145, %143 : vector<8x64xf32>
    %147 = arith.mulf %137, %125 : vector<8x64xf32>
    %148 = arith.addf %146, %147 : vector<8x64xf32>
    %149 = vector.extract_strided_slice %5 {offsets = [48, 0], sizes = [8, 192], strides = [1, 1]} : vector<64x192xf32> to vector<8x192xf32>
    %cst_28 = arith.constant dense<0.000000e+00> : vector<8x192xf32>
    %150 = tpu.matmul %148, %6, %cst_28 {dimension_numbers = #tpu.dot_dimension_numbers<[1], [0], [0], [1], [0, 0, 1, 1], [], []>} : vector<8x64xf32>, vector<64x192xf32>, vector<8x192xf32> -> vector<8x192xf32>
    %151 = vector.extract_strided_slice %149 {offsets = [0, 0], sizes = [8, 128], strides = [1, 1]} : vector<8x192xf32> to vector<8x128xf32>
    %152 = vector.extract_strided_slice %150 {offsets = [0, 0], sizes = [8, 128], strides = [1, 1]} : vector<8x192xf32> to vector<8x128xf32>
    %153 = arith.addf %151, %152 : vector<8x128xf32>
    %154 = arith.negf %153 : vector<8x128xf32>
    %155 = math.exp %154 : vector<8x128xf32>
    %cst_29 = arith.constant 1.000000e+00 : f32
    %156 = vector.broadcast %cst_29 : f32 to vector<8x128xf32>
    %157 = arith.addf %156, %155 : vector<8x128xf32>
    %158 = arith.divf %156, %157 : vector<8x128xf32>
    %159 = vector.extract_strided_slice %158 {offsets = [0, 0], sizes = [8, 64], strides = [1, 1]} : vector<8x128xf32> to vector<8x64xf32>
    %160 = vector.extract_strided_slice %158 {offsets = [0, 64], sizes = [8, 64], strides = [1, 1]} : vector<8x128xf32> to vector<8x64xf32>
    %161 = vector.extract_strided_slice %149 {offsets = [0, 128], sizes = [8, 64], strides = [1, 1]} : vector<8x192xf32> to vector<8x64xf32>
    %162 = vector.extract_strided_slice %150 {offsets = [0, 128], sizes = [8, 64], strides = [1, 1]} : vector<8x192xf32> to vector<8x64xf32>
    %163 = arith.addf %162, %9 : vector<8x64xf32>
    %164 = arith.mulf %159, %163 : vector<8x64xf32>
    %165 = arith.addf %161, %164 : vector<8x64xf32>
    %166 = math.tanh %165 : vector<8x64xf32>
    %cst_30 = arith.constant 1.000000e+00 : f32
    %167 = vector.broadcast %cst_30 : f32 to vector<8x64xf32>
    %168 = arith.subf %167, %160 : vector<8x64xf32>
    %169 = arith.mulf %168, %166 : vector<8x64xf32>
    %170 = arith.mulf %160, %148 : vector<8x64xf32>
    %171 = arith.addf %169, %170 : vector<8x64xf32>
    %172 = vector.extract_strided_slice %5 {offsets = [56, 0], sizes = [8, 192], strides = [1, 1]} : vector<64x192xf32> to vector<8x192xf32>
    %cst_31 = arith.constant dense<0.000000e+00> : vector<8x192xf32>
    %173 = tpu.matmul %171, %6, %cst_31 {dimension_numbers = #tpu.dot_dimension_numbers<[1], [0], [0], [1], [0, 0, 1, 1], [], []>} : vector<8x64xf32>, vector<64x192xf32>, vector<8x192xf32> -> vector<8x192xf32>
    %174 = vector.extract_strided_slice %172 {offsets = [0, 0], sizes = [8, 128], strides = [1, 1]} : vector<8x192xf32> to vector<8x128xf32>
    %175 = vector.extract_strided_slice %173 {offsets = [0, 0], sizes = [8, 128], strides = [1, 1]} : vector<8x192xf32> to vector<8x128xf32>
    %176 = arith.addf %174, %175 : vector<8x128xf32>
    %177 = arith.negf %176 : vector<8x128xf32>
    %178 = math.exp %177 : vector<8x128xf32>
    %cst_32 = arith.constant 1.000000e+00 : f32
    %179 = vector.broadcast %cst_32 : f32 to vector<8x128xf32>
    %180 = arith.addf %179, %178 : vector<8x128xf32>
    %181 = arith.divf %179, %180 : vector<8x128xf32>
    %182 = vector.extract_strided_slice %181 {offsets = [0, 0], sizes = [8, 64], strides = [1, 1]} : vector<8x128xf32> to vector<8x64xf32>
    %183 = vector.extract_strided_slice %181 {offsets = [0, 64], sizes = [8, 64], strides = [1, 1]} : vector<8x128xf32> to vector<8x64xf32>
    %184 = vector.extract_strided_slice %172 {offsets = [0, 128], sizes = [8, 64], strides = [1, 1]} : vector<8x192xf32> to vector<8x64xf32>
    %185 = vector.extract_strided_slice %173 {offsets = [0, 128], sizes = [8, 64], strides = [1, 1]} : vector<8x192xf32> to vector<8x64xf32>
    %186 = arith.addf %185, %9 : vector<8x64xf32>
    %187 = arith.mulf %182, %186 : vector<8x64xf32>
    %188 = arith.addf %184, %187 : vector<8x64xf32>
    %189 = math.tanh %188 : vector<8x64xf32>
    %cst_33 = arith.constant 1.000000e+00 : f32
    %190 = vector.broadcast %cst_33 : f32 to vector<8x64xf32>
    %191 = arith.subf %190, %183 : vector<8x64xf32>
    %192 = arith.mulf %191, %189 : vector<8x64xf32>
    %193 = arith.mulf %183, %171 : vector<8x64xf32>
    %194 = arith.addf %192, %193 : vector<8x64xf32>
    %195 = vector.extract_strided_slice %33 {offsets = [0, 0], sizes = [8, 32], strides = [1, 1]} : vector<8x64xf32> to vector<8x32xf32>
    %196 = vector.extract_strided_slice %56 {offsets = [0, 0], sizes = [8, 32], strides = [1, 1]} : vector<8x64xf32> to vector<8x32xf32>
    %197 = vector.extract_strided_slice %79 {offsets = [0, 0], sizes = [8, 32], strides = [1, 1]} : vector<8x64xf32> to vector<8x32xf32>
    %198 = vector.extract_strided_slice %102 {offsets = [0, 0], sizes = [8, 32], strides = [1, 1]} : vector<8x64xf32> to vector<8x32xf32>
    %199 = vector.extract_strided_slice %125 {offsets = [0, 0], sizes = [8, 32], strides = [1, 1]} : vector<8x64xf32> to vector<8x32xf32>
    %200 = vector.extract_strided_slice %148 {offsets = [0, 0], sizes = [8, 32], strides = [1, 1]} : vector<8x64xf32> to vector<8x32xf32>
    %201 = vector.extract_strided_slice %171 {offsets = [0, 0], sizes = [8, 32], strides = [1, 1]} : vector<8x64xf32> to vector<8x32xf32>
    %202 = vector.extract_strided_slice %194 {offsets = [0, 0], sizes = [8, 32], strides = [1, 1]} : vector<8x64xf32> to vector<8x32xf32>
    %203 = vector.shape_cast %195 : vector<8x32xf32> to vector<1x8x32xf32>
    %204 = vector.shape_cast %196 : vector<8x32xf32> to vector<1x8x32xf32>
    %205 = vector.shape_cast %197 : vector<8x32xf32> to vector<1x8x32xf32>
    %206 = vector.shape_cast %198 : vector<8x32xf32> to vector<1x8x32xf32>
    %207 = vector.shape_cast %199 : vector<8x32xf32> to vector<1x8x32xf32>
    %208 = vector.shape_cast %200 : vector<8x32xf32> to vector<1x8x32xf32>
    %209 = vector.shape_cast %201 : vector<8x32xf32> to vector<1x8x32xf32>
    %210 = vector.shape_cast %202 : vector<8x32xf32> to vector<1x8x32xf32>
    %211 = tpu.concatenate %203, %204, %205, %206, %207, %208, %209, %210 in 0 : vector<1x8x32xf32>, vector<1x8x32xf32>, vector<1x8x32xf32>, vector<1x8x32xf32>, vector<1x8x32xf32>, vector<1x8x32xf32>, vector<1x8x32xf32>, vector<1x8x32xf32> -> vector<8x8x32xf32>
    %212 = vector.extract_strided_slice %194 {offsets = [0, 32], sizes = [8, 32], strides = [1, 1]} : vector<8x64xf32> to vector<8x32xf32>
    %213 = vector.extract_strided_slice %171 {offsets = [0, 32], sizes = [8, 32], strides = [1, 1]} : vector<8x64xf32> to vector<8x32xf32>
    %214 = vector.extract_strided_slice %148 {offsets = [0, 32], sizes = [8, 32], strides = [1, 1]} : vector<8x64xf32> to vector<8x32xf32>
    %215 = vector.extract_strided_slice %125 {offsets = [0, 32], sizes = [8, 32], strides = [1, 1]} : vector<8x64xf32> to vector<8x32xf32>
    %216 = vector.extract_strided_slice %102 {offsets = [0, 32], sizes = [8, 32], strides = [1, 1]} : vector<8x64xf32> to vector<8x32xf32>
    %217 = vector.extract_strided_slice %79 {offsets = [0, 32], sizes = [8, 32], strides = [1, 1]} : vector<8x64xf32> to vector<8x32xf32>
    %218 = vector.extract_strided_slice %56 {offsets = [0, 32], sizes = [8, 32], strides = [1, 1]} : vector<8x64xf32> to vector<8x32xf32>
    %219 = vector.extract_strided_slice %33 {offsets = [0, 32], sizes = [8, 32], strides = [1, 1]} : vector<8x64xf32> to vector<8x32xf32>
    %220 = vector.shape_cast %212 : vector<8x32xf32> to vector<1x8x32xf32>
    %221 = vector.shape_cast %213 : vector<8x32xf32> to vector<1x8x32xf32>
    %222 = vector.shape_cast %214 : vector<8x32xf32> to vector<1x8x32xf32>
    %223 = vector.shape_cast %215 : vector<8x32xf32> to vector<1x8x32xf32>
    %224 = vector.shape_cast %216 : vector<8x32xf32> to vector<1x8x32xf32>
    %225 = vector.shape_cast %217 : vector<8x32xf32> to vector<1x8x32xf32>
    %226 = vector.shape_cast %218 : vector<8x32xf32> to vector<1x8x32xf32>
    %227 = vector.shape_cast %219 : vector<8x32xf32> to vector<1x8x32xf32>
    %228 = tpu.concatenate %220, %221, %222, %223, %224, %225, %226, %227 in 0 : vector<1x8x32xf32>, vector<1x8x32xf32>, vector<1x8x32xf32>, vector<1x8x32xf32>, vector<1x8x32xf32>, vector<1x8x32xf32>, vector<1x8x32xf32>, vector<1x8x32xf32> -> vector<8x8x32xf32>
    %229 = arith.addf %211, %228 : vector<8x8x32xf32>
    %c0_34 = arith.constant 0 : index
    %c0_35 = arith.constant 0 : index
    %c0_36 = arith.constant 0 : index
    %230 = vector.load %arg5[%c0_34, %c0_35, %c0_36] : memref<8x8x32xf32, #tpu.memory_space<vmem>>, vector<8x8x32xf32>
    tpu.vector_store %arg5[%c0_34, %c0_35, %c0_36], %229 {strides = array<i32>} : memref<8x8x32xf32, #tpu.memory_space<vmem>>, vector<8x8x32xf32>,
    %231 = vector.extract_strided_slice %194 {offsets = [0, 0], sizes = [8, 32], strides = [1, 1]} : vector<8x64xf32> to vector<8x32xf32>
    %232 = vector.extract_strided_slice %194 {offsets = [0, 32], sizes = [8, 32], strides = [1, 1]} : vector<8x64xf32> to vector<8x32xf32>
    %233 = vector.shape_cast %231 : vector<8x32xf32> to vector<1x8x32xf32>
    %234 = vector.shape_cast %232 : vector<8x32xf32> to vector<1x8x32xf32>
    %235 = tpu.concatenate %233, %234 in 0 : vector<1x8x32xf32>, vector<1x8x32xf32> -> vector<2x8x32xf32>
    %c0_37 = arith.constant 0 : index
    %c0_38 = arith.constant 0 : index
    %c0_39 = arith.constant 0 : index
    %236 = vector.load %arg6[%c0_37, %c0_38, %c0_39] : memref<2x8x32xf32, #tpu.memory_space<vmem>>, vector<2x8x32xf32>
    tpu.vector_store %arg6[%c0_37, %c0_38, %c0_39], %235 {strides = array<i32>} : memref<2x8x32xf32, #tpu.memory_space<vmem>>, vector<2x8x32xf32>,
    return
  }
}

</mosaic_0001>

<bundles_post_ra>
// kernel: encoder_rnn_forward.1
= control target key start
LH: loop header
LB: loop body
LE: loop exit
PB: predicated region body
PF: predicated region fallthrough
CT: control target
= control target key end

     0   :  { %vm52_vm0 = vcmask 523264   ;;  %v973_v28 = vmov 0.0   ;;  %s1487_s3 = inlined_call_operand.vmem [shape: f32[64,192], index: 3, kind: input, shape index: {}]   ;;  %s1488_s1 = inlined_call_operand.vmem [shape: f32[64,192], index: 1, kind: input, shape index: {}]   ;;  %s1489_s0 = inlined_call_operand.vmem [shape: f32[64,64], index: 0, kind: input, shape index: {}]   ;;  %s1490_s4 = inlined_call_operand.vmem [shape: f32[1,64], index: 4, kind: input, shape index: {}]   ;;  %s1491_s2 = inlined_call_operand.vmem [shape: f32[1,192], index: 2, kind: input, shape index: {}]   ;;  %s1492_s5 = inlined_call_operand.vmem [shape: f32[8,8,32], index: 5, kind: output, shape index: {0}]   ;;  %s1493_s6 = inlined_call_operand.vmem [shape: f32[2,8,32], index: 6, kind: output, shape index: {1}]  }
   0x1   :  { %v1014_v0 = vld [vmem:[%s1487_s3 + $0x70] sm:$0xff]  ;;  %v1019_v1 = vld [vmem:[%s1487_s3 + $0x60] sm:$0xff]  ;;  %v1049_v8 = vld [vmem:[%s1487_s3 + $0x78] sm:$0xff] }
   0x2   :  { %v44_v2 = vld [vmem:[%s1488_s1 + $0x70] sm:$0xff]  ;;  %190 = vmatpush.msra.mxu2 %v1014_v0  ;;  %v42_v3 = vld [vmem:[%s1488_s1 + $0x60] sm:$0xff]  ;;  %210 = vmatpush.msra.mxu3 %v1049_v8  ;;  %v1063_v11 = vld [vmem:[%s1487_s3 + $0x68] sm:$0xff] }
   0x3   :  { %85 = vmatpush.msra.mxu0 %v44_v2  ;;  %v1031_v4 = vld [vmem:[%s1487_s3 + $0x50] sm:$0xff]  ;;  %v1040_v6 = vld [vmem:[%s1487_s3 + $0x40] sm:$0xff]  ;;  %v1069_v12 = vld [vmem:[%s1487_s3 + $0x58] sm:$0xff] }
   0x4   :  { %v40_v5 = vld [vmem:[%s1488_s1 + $0x50] sm:$0xff]  ;;  %191 = vmatpush.msra.mxu2 %v1019_v1  ;;  %v38_v7 = vld [vmem:[%s1488_s1 + $0x40] sm:$0xff]  ;;  %v45_v13 = vld [vmem:[%s1488_s1 + $0x78] sm:$0xff]  ;;  %211 = vmatpush.msra.mxu3 %v1063_v11 }
   0x5   :  { %86 = vmatpush.msra.mxu0 %v42_v3  ;;  %v1054_v9 = vld [vmem:[%s1487_s3 + $0x30] sm:$0xff]  ;;  %v43_v14 = vld [vmem:[%s1488_s1 + $0x68] sm:$0xff]  ;;  %v1080_v15 = vld [vmem:[%s1487_s3 + $0x20] sm:$0xff]  ;;  %126 = vmatpush.msra.mxu1 %v45_v13 }
   0x6   :  { %192 = vmatpush.msra.mxu2 %v1031_v4  ;;  %v36_v10 = vld [vmem:[%s1488_s1 + $0x30] sm:$0xff]  ;;  %v34_v16 = vld [vmem:[%s1488_s1 + $0x20] sm:$0xff]  ;;  %v1090_v17 = vld [vmem:[%s1487_s3 + $0x48] sm:$0xff]  ;;  %212 = vmatpush.msra.mxu3 %v1069_v12 }
   0x7   :  { %87 = vmatpush.msra.mxu0 %v40_v5  ;;  %v41_v18 = vld [vmem:[%s1488_s1 + $0x58] sm:$0xff]  ;;  %v1098_v19 = vld [vmem:[%s1487_s3 + $0x10] sm:$0xff]  ;;  %127 = vmatpush.msra.mxu1 %v43_v14  ;;  %v39_v22 = vld [vmem:[%s1488_s1 + $0x48] sm:$0xff] }
   0x8   :  { %193 = vmatpush.msra.mxu2 %v1040_v6  ;;  %v32_v20 = vld [vmem:[%s1488_s1 + $0x10] sm:$0xff]  ;;  %v1108_v21 = vld [vmem:[%s1487_s3 + $0x38] sm:$0xff]  ;;  %v1116_v23 = vld [vmem:[%s1487_s3] sm:$0xff]  ;;  %213 = vmatpush.msra.mxu3 %v1090_v17 }
   0x9   :  { %88 = vmatpush.msra.mxu0 %v38_v7  ;;  %v30_v24 = vld [vmem:[%s1488_s1] sm:$0xff]  ;;  %128 = vmatpush.msra.mxu1 %v41_v18  ;;  %v1130_v26 = vld [vmem:[%s1487_s3 + $0x28] sm:$0xff]  ;;  %v37_v27 = vld [vmem:[%s1488_s1 + $0x38] sm:$0xff] }
   0xa   :  { %194 = vmatpush.msra.mxu2 %v1054_v9  ;;  %v22_v25 = vld [vmem:[%s1489_s0] sm:$0xff]  ;;  %214 = vmatpush.msra.mxu3 %v1108_v21  ;;  %v1140_v29 = vld [vmem:[%s1487_s3 + $0x18] sm:$0xff]  ;;  %v35_v30 = vld [vmem:[%s1488_s1 + $0x28] sm:$0xff] }
   0xb   :  { %89 = vmatpush.msra.mxu0 %v36_v10  ;;  %129 = vmatpush.msra.mxu1 %v39_v22  ;;  %v1149_v31 = vld [vmem:[%s1487_s3 + $0x8] sm:$0xff]  ;;  %v33_v32 = vld [vmem:[%s1488_s1 + $0x18] sm:$0xff]  ;;  %v46_v34 = vld [vmem:[%s1491_s2] sm:$0x3]  ;;  %s974_s2 = smov 64  }
   0xc   :  { %195 = vmatpush.msra.mxu2 %v1080_v15  ;;  %215 = vmatpush.msra.mxu3 %v1130_v26  ;;  %v31_v33 = vld [vmem:[%s1488_s1 + $0x8] sm:$0xff]  ;;  %v1227_v35 = vperm.slane %v46_v34, 0  ;;  %v1233_v45 = vld [vmem:[%s1490_s4] ss:$0 sm:$0xff]  ;;  %v1235_v51 = vperm.slane %v46_v34, 1 }
   0xd   :  { %90 = vmatpush.msra.mxu0 %v34_v16  ;;  %130 = vmatpush.msra.mxu1 %v37_v27  ;;  %v23_v7 = vld [vmem:[%s1489_s0 + $0x8] sm:$0xff] }
   0xe   :  { %196 = vmatpush.msra.mxu2 %v1098_v19  ;;  %216 = vmatpush.msra.mxu3 %v1140_v29 }
   0xf   :  { %91 = vmatpush.msra.mxu0 %v32_v20  ;;  %131 = vmatpush.msra.mxu1 %v35_v30 }
  0x10   :  { %197 = vmatpush.msra.mxu2 %v1116_v23  ;;  %217 = vmatpush.msra.mxu3 %v1149_v31 }
  0x11   :  { %92 = vmatpush.msra.mxu0 %v30_v24  ;;  %198 = vmatmul.f32.vlgmr.msra.gmra.mxu2 %v973_v28 }
  0x12   :  { %883 = vmatmul.msk.f32.vlgmr.msra.gmra.mxu0 %vm52_vm0, %v22_v25  ;;  %267 = vmatpush.msrb.mxu2 %v1014_v0 }
  0x13   :  { %498 = vmatpush.msrb.mxu0 %v1014_v0  ;;  %132 = vmatpush.msra.mxu1 %v33_v32 }
  0x14   :  { %268 = vmatpush.msrb.mxu2 %v1019_v1  ;;  %218 = vmatmul.f32.vlgmr.msra.gmra.mxu3 %v973_v28 }
  0x15   :  { %499 = vmatpush.msrb.mxu0 %v1019_v1  ;;  %133 = vmatpush.msra.mxu1 %v31_v33 }
  0x16   :  { %269 = vmatpush.msrb.mxu2 %v1031_v4  ;;  %287 = vmatpush.msrb.mxu3 %v1049_v8 }
  0x17   :  { %891 = vmatmul.msk.f32.vlgmr.msra.gmra.mxu1 %vm52_vm0, %v22_v25  ;;  %500 = vmatpush.msrb.mxu0 %v1031_v4 }
  0x18   :  { %270 = vmatpush.msrb.mxu2 %v1040_v6  ;;  %288 = vmatpush.msrb.mxu3 %v1063_v11 }
  0x19   :  { %518 = vmatpush.msrb.mxu1 %v1049_v8  ;;  %501 = vmatpush.msrb.mxu0 %v1040_v6 }
  0x1a   :  { %271 = vmatpush.msrb.mxu2 %v1054_v9  ;;  %289 = vmatpush.msrb.mxu3 %v1069_v12 }
  0x1b   :  { %519 = vmatpush.msrb.mxu1 %v1063_v11  ;;  %502 = vmatpush.msrb.mxu0 %v1054_v9 }
  0x1c   :  { %272 = vmatpush.msrb.mxu2 %v1080_v15  ;;  %290 = vmatpush.msrb.mxu3 %v1090_v17 }
  0x1d   :  { %520 = vmatpush.msrb.mxu1 %v1069_v12  ;;  %503 = vmatpush.msrb.mxu0 %v1080_v15 }
  0x1e   :  { %273 = vmatpush.msrb.mxu2 %v1098_v19  ;;  %291 = vmatpush.msrb.mxu3 %v1108_v21 }
  0x1f   :  { %521 = vmatpush.msrb.mxu1 %v1090_v17  ;;  %504 = vmatpush.msrb.mxu0 %v1098_v19 }
  0x20   :  { %274 = vmatpush.msrb.mxu2 %v1116_v23  ;;  %292 = vmatpush.msrb.mxu3 %v1130_v26 }
  0x21   :  { %522 = vmatpush.msrb.mxu1 %v1108_v21  ;;  %505 = vmatpush.msrb.mxu0 %v1116_v23 }
  0x22   :  { %344 = vmatpush.msra.mxu2 %v1014_v0  ;;  %293 = vmatpush.msrb.mxu3 %v1140_v29 }
  0x23   :  { %523 = vmatpush.msrb.mxu1 %v1130_v26  ;;  %652 = vmatpush.msra.mxu0 %v1014_v0 }
  0x24   :  { %345 = vmatpush.msra.mxu2 %v1019_v1  ;;  %294 = vmatpush.msrb.mxu3 %v1149_v31 }
  0x25   :  { %524 = vmatpush.msrb.mxu1 %v1140_v29  ;;  %653 = vmatpush.msra.mxu0 %v1019_v1 }
  0x26   :  { %346 = vmatpush.msra.mxu2 %v1031_v4  ;;  %364 = vmatpush.msra.mxu3 %v1049_v8 }
  0x27   :  { %525 = vmatpush.msrb.mxu1 %v1149_v31  ;;  %654 = vmatpush.msra.mxu0 %v1031_v4 }
  0x28   :  { %347 = vmatpush.msra.mxu2 %v1040_v6  ;;  %365 = vmatpush.msra.mxu3 %v1063_v11 }
  0x29   :  { %672 = vmatpush.msra.mxu1 %v1049_v8  ;;  %655 = vmatpush.msra.mxu0 %v1040_v6 }
  0x2a   :  { %348 = vmatpush.msra.mxu2 %v1054_v9  ;;  %366 = vmatpush.msra.mxu3 %v1069_v12 }
  0x2b   :  { %673 = vmatpush.msra.mxu1 %v1063_v11  ;;  %656 = vmatpush.msra.mxu0 %v1054_v9 }
  0x2c   :  { %349 = vmatpush.msra.mxu2 %v1080_v15  ;;  %367 = vmatpush.msra.mxu3 %v1090_v17 }
  0x2d   :  { %674 = vmatpush.msra.mxu1 %v1069_v12  ;;  %657 = vmatpush.msra.mxu0 %v1080_v15 }
  0x2e   :  { %350 = vmatpush.msra.mxu2 %v1098_v19  ;;  %368 = vmatpush.msra.mxu3 %v1108_v21 }
  0x2f   :  { %675 = vmatpush.msra.mxu1 %v1090_v17  ;;  %658 = vmatpush.msra.mxu0 %v1098_v19 }
  0x30   :  { %351 = vmatpush.msra.mxu2 %v1116_v23  ;;  %369 = vmatpush.msra.mxu3 %v1130_v26 }
  0x31   :  { %676 = vmatpush.msra.mxu1 %v1108_v21  ;;  %659 = vmatpush.msra.mxu0 %v1116_v23 }
  0x32   :  { %370 = vmatpush.msra.mxu3 %v1140_v29  ;;  %884 = vmatmul.msk.f32.gmra.mxu0 %vm52_vm0, %v23_v7 }
  0x33   :  { %677 = vmatpush.msra.mxu1 %v1130_v26 }
  0x34   :  { %371 = vmatpush.msra.mxu3 %v1149_v31  ;;  %892 = vmatmul.msk.f32.gmra.mxu1 %vm52_vm0, %v23_v7 }
  0x35   :  { %678 = vmatpush.msra.mxu1 %v1140_v29 }
  0x37   :  { %679 = vmatpush.msra.mxu1 %v1149_v31 }
  0x8f   :  { %v94_v36 = vpop.f32.mrf.mxu0 }
  0x90   :  { %v95_v37 = vadd.f32 %v94_v36, %v1227_v35 }
  0x94   :  { %v199_v38 = vpop.f32.mrf.mxu2  ;;  %v135_v52 = vpop.f32.mrf.mxu1 }
  0x95   :  { %v222_v39 = vadd.f32 %v199_v38, %v95_v37  ;;  %v136_v57 = vadd.f32 %v135_v52, %v1235_v51 }
  0x97   :  { %v899_v40 = vmul.f32 -1.442695, %v222_v39  ;;  %v219_v47 = vpop.f32.mrf.mxu3 }
  0x98   :  { %v242_v54 = vadd.f32 %v1233_v45, %v219_v47 }
  0x99   :  { %925 = vpow2.f32 %v899_v40 }
  0x9f   :  { %v926_v41 = vpop.eup %925 }
  0xa0   :  { %v226_v42 = vadd.f32 1.0, %v926_v41 }
  0xa2   :  { %927 = vrcp.f32 %v226_v42  ;;  %v238_v48 = vand.u32 2147483648, %v226_v42  ;;  %v236_v50 = vand.u32 2147483647, %v226_v42  ;;  %vm232_vm2 = vweird.f32 %v226_v42 }
  0xa4   :  { %v239_v55 = vor.u32 1.1754944e-38, %v238_v48  ;;  %vm237_vm4 = vcmp.eq.f32.partialorder %v236_v50, 8.507059e+37 }
  0xa8   :  { %v928_v43 = vpop.eup %927 }
  0xa9   :  { %v228_v44 = vmul.f32 %v928_v43, %v226_v42  ;;  %vm233_vm1 = vweird.f32 %v928_v43 }
  0xaa   :  { %vm234_vm3 = vmor %vm232_vm2, %vm233_vm1 }
  0xab   :  { %v229_v46 = vsub.f32 1.0, %v228_v44 }
  0xad   :  { %v230_v49 = vmul.f32 %v928_v43, %v229_v46 }
  0xaf   :  { %v231_v53 = vadd.f32 %v928_v43, %v230_v49  ;;  %v97_v13 = vpop.f32.mrf.mxu0 }
  0xb0   :  { %v98_v14 = vadd.f32 %v97_v13, %v1227_v35 }
  0xb1   :  { %v235_v56 = vsel %vm234_vm3, %v928_v43, %v231_v53  ;;  %v138_v36 = vpop.f32.mrf.mxu1  ;;  %v24_v53 = vld [vmem:[%s1489_s0 + $0x10] sm:$0xff] }
  0xb2   :  { %v240_v58 = vsel %vm237_vm4, %v239_v55, %v235_v56  ;;  %v139_v41 = vadd.f32 %v138_v36, %v1235_v51  ;;  %885 = vmatmul.msk.f32.gmra.mxu0 %vm52_vm0, %v24_v53  ;;  %893 = vmatmul.msk.f32.gmra.mxu1 %vm52_vm0, %v24_v53  ;;  %v28_v53 = vld [vmem:[%s1489_s0 + $0x30] sm:$0xff] }
  0xb3   :  { %v243_v59 = vmul.f32 %v242_v54, %v240_v58  ;;  %v246_v62 = vsub.f32 1.0, %v240_v58  ;;  %v252_v2 = vmul.f32 0.0, %v240_v58 }
  0xb5   :  { %v244_v60 = vadd.f32 %v243_v59, %v136_v57 }
  0xb7   :  { %929 = vtanh.f32 %v244_v60 }
  0xbd   :  { %v930_v61 = vpop.eup %929 }
  0xbe   :  { %248 = vrot.lane.b32.xlu0 %v930_v61, %s974_s2 }
 0x12f   :  { %v100_v55 = vpop.f32.mrf.mxu0 }
 0x130   :  { %v249_v63 = vpop.permute.xlu0 %248  ;;  %v101_v56 = vadd.f32 %v100_v55, %v1227_v35 }
 0x131   :  { %v251_v3 = vmul.f32 %v249_v63, %v246_v62 }
 0x133   :  { %v1240_v5 = vadd.f32 %v252_v2, %v251_v3 }
 0x135   :  { %255 = vrot.lane.b32.xlu0 %v1240_v5, %s974_s2 }
 0x1a7   :  { %v256_v10 = vpop.permute.xlu0 %255 }
 0x1a8   :  { %900 = vmatmul.msk.f32.vlgmr.msrb.gmra.mxu2 %vm52_vm0, %v256_v10  ;;  %901 = vmatmul.msk.f32.vlgmr.msrb.gmra.mxu3 %vm52_vm0, %v256_v10 }
 0x1a9   :  { %421 = vmatpush.msrb.mxu2 %v1014_v0  ;;  %441 = vmatpush.msrb.mxu3 %v1049_v8 }
 0x1ab   :  { %422 = vmatpush.msrb.mxu2 %v1019_v1  ;;  %442 = vmatpush.msrb.mxu3 %v1063_v11 }
 0x1ad   :  { %423 = vmatpush.msrb.mxu2 %v1031_v4  ;;  %443 = vmatpush.msrb.mxu3 %v1069_v12 }
 0x1af   :  { %424 = vmatpush.msrb.mxu2 %v1040_v6  ;;  %444 = vmatpush.msrb.mxu3 %v1090_v17 }
 0x1b1   :  { %425 = vmatpush.msrb.mxu2 %v1054_v9  ;;  %445 = vmatpush.msrb.mxu3 %v1108_v21 }
 0x1b3   :  { %426 = vmatpush.msrb.mxu2 %v1080_v15  ;;  %446 = vmatpush.msrb.mxu3 %v1130_v26 }
 0x1b5   :  { %427 = vmatpush.msrb.mxu2 %v1098_v19  ;;  %447 = vmatpush.msrb.mxu3 %v1140_v29 }
 0x1b7   :  { %428 = vmatpush.msrb.mxu2 %v1116_v23  ;;  %448 = vmatpush.msrb.mxu3 %v1149_v31 }
 0x22b   :  { %v276_v16 = vpop.f32.mrf.mxu2  ;;  %v296_v34 = vpop.f32.mrf.mxu3 }
 0x22c   :  { %v299_v18 = vadd.f32 %v276_v16, %v98_v14  ;;  %v319_v40 = vadd.f32 %v1233_v45, %v296_v34  ;;  %v141_v14 = vpop.f32.mrf.mxu1 }
 0x22e   :  { %v902_v20 = vmul.f32 -1.442695, %v299_v18 }
 0x230   :  { %931 = vpow2.f32 %v902_v20 }
 0x236   :  { %v932_v22 = vpop.eup %931 }
 0x237   :  { %v303_v24 = vadd.f32 1.0, %v932_v22 }
 0x239   :  { %933 = vrcp.f32 %v303_v24  ;;  %v315_v30 = vand.u32 2147483648, %v303_v24  ;;  %v313_v33 = vand.u32 2147483647, %v303_v24  ;;  %vm309_vm6 = vweird.f32 %v303_v24 }
 0x23b   :  { %v316_v38 = vor.u32 1.1754944e-38, %v315_v30  ;;  %vm314_vm8 = vcmp.eq.f32.partialorder %v313_v33, 8.507059e+37 }
 0x23f   :  { %v934_v25 = vpop.eup %933 }
 0x240   :  { %v305_v27 = vmul.f32 %v934_v25, %v303_v24  ;;  %vm310_vm5 = vweird.f32 %v934_v25  ;;  %v142_v24 = vadd.f32 %v141_v14, %v1235_v51 }
 0x241   :  { %vm311_vm7 = vmor %vm309_vm6, %vm310_vm5 }
 0x242   :  { %v306_v28 = vsub.f32 1.0, %v305_v27 }
 0x244   :  { %v307_v32 = vmul.f32 %v934_v25, %v306_v28 }
 0x246   :  { %v308_v37 = vadd.f32 %v934_v25, %v307_v32 }
 0x248   :  { %v312_v39 = vsel %vm311_vm7, %v934_v25, %v308_v37 }
 0x249   :  { %v317_v42 = vsel %vm314_vm8, %v316_v38, %v312_v39  ;;  %v25_v38 = vld [vmem:[%s1489_s0 + $0x18] sm:$0xff] }
 0x24a   :  { %v320_v43 = vmul.f32 %v319_v40, %v317_v42  ;;  %v323_v47 = vsub.f32 1.0, %v317_v42  ;;  %v329_v49 = vmul.f32 %v317_v42, %v1240_v5  ;;  %886 = vmatmul.msk.f32.gmra.mxu0 %vm52_vm0, %v25_v38  ;;  %894 = vmatmul.msk.f32.gmra.mxu1 %vm52_vm0, %v25_v38 }
 0x24c   :  { %v321_v44 = vadd.f32 %v320_v43, %v139_v41 }
 0x24e   :  { %935 = vtanh.f32 %v321_v44 }
 0x254   :  { %v936_v46 = vpop.eup %935 }
 0x255   :  { %325 = vrot.lane.b32.xlu1 %v936_v46, %s974_s2 }
 0x2c7   :  { %v326_v48 = vpop.permute.xlu1 %325 }
 0x2c8   :  { %v328_v50 = vmul.f32 %v326_v48, %v323_v47 }
 0x2ca   :  { %v1272_v52 = vadd.f32 %v329_v49, %v328_v50  ;;  %v26_v49 = vld [vmem:[%s1489_s0 + $0x20] sm:$0xff]  ;;  %v27_v50 = vld [vmem:[%s1489_s0 + $0x28] sm:$0xff] }
 0x2cb   :  { %887 = vmatmul.msk.f32.gmra.mxu0 %vm52_vm0, %v26_v49  ;;  %895 = vmatmul.msk.f32.gmra.mxu1 %vm52_vm0, %v26_v49 }
 0x2cc   :  { %332 = vrot.lane.b32.xlu1 %v1272_v52, %s974_s2 }
 0x2d3   :  { %888 = vmatmul.msk.f32.gmra.mxu0 %vm52_vm0, %v27_v50  ;;  %896 = vmatmul.msk.f32.gmra.mxu1 %vm52_vm0, %v27_v50 }
 0x2db   :  { %889 = vmatmul.msk.f32.gmra.mxu0 %vm52_vm0, %v28_v53  ;;  %897 = vmatmul.msk.f32.gmra.mxu1 %vm52_vm0, %v28_v53 }
 0x33e   :  { %v333_v54 = vpop.permute.xlu1 %332 }
 0x33f   :  { %903 = vmatmul.msk.f32.vlgmr.msra.gmra.mxu2 %vm52_vm0, %v333_v54  ;;  %904 = vmatmul.msk.f32.vlgmr.msra.gmra.mxu3 %vm52_vm0, %v333_v54  ;;  %v29_v54 = vld [vmem:[%s1489_s0 + $0x38] sm:$0xff]  ;;  %s975_s0 = smov 96  }
 0x340   :  { %575 = vmatpush.msra.mxu2 %v1014_v0  ;;  %595 = vmatpush.msra.mxu3 %v1049_v8 }
 0x341   :  { %890 = vmatmul.msk.f32.gmra.mxu0 %vm52_vm0, %v29_v54  ;;  %898 = vmatmul.msk.f32.gmra.mxu1 %vm52_vm0, %v29_v54 }
 0x342   :  { %576 = vmatpush.msra.mxu2 %v1019_v1  ;;  %596 = vmatpush.msra.mxu3 %v1063_v11 }
 0x344   :  { %577 = vmatpush.msra.mxu2 %v1031_v4  ;;  %597 = vmatpush.msra.mxu3 %v1069_v12 }
 0x346   :  { %578 = vmatpush.msra.mxu2 %v1040_v6  ;;  %598 = vmatpush.msra.mxu3 %v1090_v17 }
 0x348   :  { %579 = vmatpush.msra.mxu2 %v1054_v9  ;;  %599 = vmatpush.msra.mxu3 %v1108_v21 }
 0x34a   :  { %580 = vmatpush.msra.mxu2 %v1080_v15  ;;  %600 = vmatpush.msra.mxu3 %v1130_v26 }
 0x34c   :  { %581 = vmatpush.msra.mxu2 %v1098_v19  ;;  %601 = vmatpush.msra.mxu3 %v1140_v29 }
 0x34e   :  { %582 = vmatpush.msra.mxu2 %v1116_v23  ;;  %602 = vmatpush.msra.mxu3 %v1149_v31 }
 0x3c2   :  { %v353_v57 = vpop.f32.mrf.mxu2  ;;  %v373_v13 = vpop.f32.mrf.mxu3 }
 0x3c3   :  { %v376_v58 = vadd.f32 %v353_v57, %v101_v56  ;;  %v396_v22 = vadd.f32 %v1233_v45, %v373_v13 }
 0x3c5   :  { %v905_v59 = vmul.f32 -1.442695, %v376_v58 }
 0x3c7   :  { %937 = vpow2.f32 %v905_v59 }
 0x3cd   :  { %v938_v60 = vpop.eup %937 }
 0x3ce   :  { %v380_v61 = vadd.f32 1.0, %v938_v60 }
 0x3d0   :  { %939 = vrcp.f32 %v380_v61  ;;  %v392_v3 = vand.u32 2147483648, %v380_v61  ;;  %v390_v10 = vand.u32 2147483647, %v380_v61  ;;  %vm386_vm10 = vweird.f32 %v380_v61 }
 0x3d2   :  { %v393_v18 = vor.u32 1.1754944e-38, %v392_v3  ;;  %vm391_vm12 = vcmp.eq.f32.partialorder %v390_v10, 8.507059e+37 }
 0x3d6   :  { %v940_v62 = vpop.eup %939 }
 0x3d7   :  { %v382_v63 = vmul.f32 %v940_v62, %v380_v61  ;;  %vm387_vm9 = vweird.f32 %v940_v62 }
 0x3d8   :  { %vm388_vm11 = vmor %vm386_vm10, %vm387_vm9 }
 0x3d9   :  { %v383_v2 = vsub.f32 1.0, %v382_v63 }
 0x3db   :  { %v384_v7 = vmul.f32 %v940_v62, %v383_v2 }
 0x3dd   :  { %v385_v16 = vadd.f32 %v940_v62, %v384_v7 }
 0x3df   :  { %v389_v20 = vsel %vm388_vm11, %v940_v62, %v385_v16 }
 0x3e0   :  { %v394_v25 = vsel %vm391_vm12, %v393_v18, %v389_v20 }
 0x3e1   :  { %v397_v27 = vmul.f32 %v396_v22, %v394_v25  ;;  %v400_v32 = vsub.f32 1.0, %v394_v25  ;;  %v406_v34 = vmul.f32 %v394_v25, %v1272_v52 }
 0x3e3   :  { %v398_v28 = vadd.f32 %v397_v27, %v142_v24 }
 0x3e5   :  { %941 = vtanh.f32 %v398_v28 }
 0x3eb   :  { %v942_v30 = vpop.eup %941 }
 0x3ec   :  { %402 = vrot.lane.b32.xlu2 %v942_v30, %s974_s2 }
 0x446   :  { %v403_v33 = vpop.permute.xlu2 %402 }
 0x447   :  { %v405_v36 = vmul.f32 %v403_v33, %v400_v32 }
 0x449   :  { %v1304_v37 = vadd.f32 %v406_v34, %v405_v36 }
 0x44b   :  { %409 = vrot.lane.b32.xlu2 %v1304_v37, %s974_s2 }
 0x4a5   :  { %v410_v39 = vpop.permute.xlu2 %409 }
 0x4a6   :  { %906 = vmatmul.msk.f32.vlgmr.msrb.gmra.mxu2 %vm52_vm0, %v410_v39  ;;  %907 = vmatmul.msk.f32.vlgmr.msrb.gmra.mxu3 %vm52_vm0, %v410_v39 }
 0x4a7   :  { %729 = vmatpush.msrb.mxu2 %v1014_v0  ;;  %749 = vmatpush.msrb.mxu3 %v1049_v8  ;;  %v103_v0 = vpop.f32.mrf.mxu0 }
 0x4a9   :  { %730 = vmatpush.msrb.mxu2 %v1019_v1  ;;  %750 = vmatpush.msrb.mxu3 %v1063_v11  ;;  %v104_v1 = vadd.f32 %v103_v0, %v1227_v35 }
 0x4ab   :  { %731 = vmatpush.msrb.mxu2 %v1031_v4  ;;  %751 = vmatpush.msrb.mxu3 %v1069_v12 }
 0x4ad   :  { %732 = vmatpush.msrb.mxu2 %v1040_v6  ;;  %752 = vmatpush.msrb.mxu3 %v1090_v17 }
 0x4af   :  { %733 = vmatpush.msrb.mxu2 %v1054_v9  ;;  %753 = vmatpush.msrb.mxu3 %v1108_v21  ;;  %v106_v61 = vpop.f32.mrf.mxu0 }
 0x4b0   :  { %v107_v10 = vadd.f32 %v106_v61, %v1227_v35 }
 0x4b1   :  { %734 = vmatpush.msrb.mxu2 %v1080_v15  ;;  %754 = vmatpush.msrb.mxu3 %v1130_v26 }
 0x4b3   :  { %735 = vmatpush.msrb.mxu2 %v1098_v19  ;;  %755 = vmatpush.msrb.mxu3 %v1140_v29  ;;  %v144_v29 = vpop.f32.mrf.mxu1 }
 0x4b4   :  { %v145_v43 = vadd.f32 %v144_v29, %v1235_v51 }
 0x4b5   :  { %736 = vmatpush.msrb.mxu2 %v1116_v23  ;;  %756 = vmatpush.msrb.mxu3 %v1149_v31 }
 0x4b7   :  { %v109_v62 = vpop.f32.mrf.mxu0 }
 0x4bb   :  { %v147_v2 = vpop.f32.mrf.mxu1 }
 0x4bf   :  { %v1362_v63 = vpop.f32.mrf.mxu0 }
 0x4c3   :  { %v1366_v7 = vpop.f32.mrf.mxu1 }
 0x4c7   :  { %v1364_v3 = vpop.f32.mrf.mxu0 }
 0x4cb   :  { %v1369_v18 = vpop.f32.mrf.mxu1 }
 0x4d3   :  { %v1371_v24 = vpop.f32.mrf.mxu1 }
 0x529   :  { %v430_v4 = vpop.f32.mrf.mxu2  ;;  %v450_v23 = vpop.f32.mrf.mxu3 }
 0x52a   :  { %v453_v6 = vadd.f32 %v430_v4, %v104_v1  ;;  %v473_v42 = vadd.f32 %v1233_v45, %v450_v23  ;;  %v148_v4 = vadd.f32 %v147_v2, %v1235_v51 }
 0x52c   :  { %v908_v8 = vmul.f32 -1.442695, %v453_v6 }
 0x52e   :  { %943 = vpow2.f32 %v908_v8 }
 0x534   :  { %v944_v9 = vpop.eup %943 }
 0x535   :  { %v457_v11 = vadd.f32 1.0, %v944_v9 }
 0x537   :  { %945 = vrcp.f32 %v457_v11  ;;  %v469_v19 = vand.u32 2147483648, %v457_v11  ;;  %v467_v26 = vand.u32 2147483647, %v457_v11  ;;  %vm463_vm14 = vweird.f32 %v457_v11 }
 0x539   :  { %v470_v40 = vor.u32 1.1754944e-38, %v469_v19  ;;  %vm468_vm1 = vcmp.eq.f32.partialorder %v467_v26, 8.507059e+37  ;;  %v110_v26 = vadd.f32 %v109_v62, %v1227_v35 }
 0x53d   :  { %v946_v12 = vpop.eup %945 }
 0x53e   :  { %v459_v15 = vmul.f32 %v946_v12, %v457_v11  ;;  %vm464_vm13 = vweird.f32 %v946_v12 }
 0x53f   :  { %vm465_vm15 = vmor %vm463_vm14, %vm464_vm13 }
 0x540   :  { %v460_v17 = vsub.f32 1.0, %v459_v15 }
 0x542   :  { %v461_v21 = vmul.f32 %v946_v12, %v460_v17 }
 0x544   :  { %v462_v31 = vadd.f32 %v946_v12, %v461_v21 }
 0x546   :  { %v466_v41 = vsel %vm465_vm15, %v946_v12, %v462_v31 }
 0x547   :  { %v471_v44 = vsel %vm468_vm1, %v470_v40, %v466_v41 }
 0x548   :  { %v474_v46 = vmul.f32 %v473_v42, %v471_v44  ;;  %v477_v55 = vsub.f32 1.0, %v471_v44  ;;  %v483_v57 = vmul.f32 %v471_v44, %v1304_v37 }
 0x54a   :  { %v475_v47 = vadd.f32 %v474_v46, %v145_v43 }
 0x54c   :  { %947 = vtanh.f32 %v475_v47 }
 0x552   :  { %v948_v48 = vpop.eup %947 }
 0x553   :  { %479 = vrot.lane.b32.xlu0 %v948_v48, %s974_s2 }
 0x5c5   :  { %v480_v56 = vpop.permute.xlu0 %479 }
 0x5c6   :  { %v482_v58 = vmul.f32 %v480_v56, %v477_v55 }
 0x5c8   :  { %v1356_v59 = vadd.f32 %v483_v57, %v482_v58  ;;  %v151_v57 = vadd.f32 %v1366_v7, %v1235_v51  ;;  %v113_v7 = vadd.f32 %v1362_v63, %v1227_v35 }
 0x5ca   :  { %486 = vrot.lane.b32.xlu1 %v1356_v59, %s974_s2 }
 0x63c   :  { %v487_v60 = vpop.permute.xlu1 %486 }
 0x63d   :  { %909 = vmatmul.msk.f32.vlgmr.msrb.gmra.mxu0 %vm52_vm0, %v487_v60  ;;  %910 = vmatmul.msk.f32.vlgmr.msrb.gmra.mxu1 %vm52_vm0, %v487_v60 }
 0x6ba   :  { %v507_v13 = vpop.f32.mrf.mxu0  ;;  %v527_v34 = vpop.f32.mrf.mxu1 }
 0x6bb   :  { %v530_v14 = vadd.f32 %v507_v13, %v107_v10  ;;  %v550_v0 = vadd.f32 %v1233_v45, %v527_v34 }
 0x6bd   :  { %v911_v16 = vmul.f32 -1.442695, %v530_v14 }
 0x6bf   :  { %949 = vpow2.f32 %v911_v16 }
 0x6c5   :  { %v950_v20 = vpop.eup %949 }
 0x6c6   :  { %v534_v22 = vadd.f32 1.0, %v950_v20 }
 0x6c8   :  { %951 = vrcp.f32 %v534_v22  ;;  %v546_v30 = vand.u32 2147483648, %v534_v22  ;;  %v544_v33 = vand.u32 2147483647, %v534_v22  ;;  %vm540_vm3 = vweird.f32 %v534_v22 }
 0x6ca   :  { %v547_v38 = vor.u32 1.1754944e-38, %v546_v30  ;;  %vm545_vm5 = vcmp.eq.f32.partialorder %v544_v33, 8.507059e+37 }
 0x6ce   :  { %v952_v25 = vpop.eup %951 }
 0x6cf   :  { %v536_v27 = vmul.f32 %v952_v25, %v534_v22  ;;  %vm541_vm2 = vweird.f32 %v952_v25 }
 0x6d0   :  { %vm542_vm4 = vmor %vm540_vm3, %vm541_vm2  ;;  %vm858_vm2 = vcmask 261120  }
 0x6d1   :  { %v537_v28 = vsub.f32 1.0, %v536_v27 }
 0x6d3   :  { %v538_v32 = vmul.f32 %v952_v25, %v537_v28 }
 0x6d5   :  { %v539_v36 = vadd.f32 %v952_v25, %v538_v32 }
 0x6d7   :  { %v543_v39 = vsel %vm542_vm4, %v952_v25, %v539_v36 }
 0x6d8   :  { %v548_v1 = vsel %vm545_vm5, %v547_v38, %v543_v39 }
 0x6d9   :  { %v551_v6 = vmul.f32 %v550_v0, %v548_v1  ;;  %v554_v11 = vsub.f32 1.0, %v548_v1  ;;  %v560_v15 = vmul.f32 %v548_v1, %v1356_v59 }
 0x6db   :  { %v552_v8 = vadd.f32 %v551_v6, %v148_v4 }
 0x6dd   :  { %953 = vtanh.f32 %v552_v8  ;;  %v154_v8 = vadd.f32 %v1369_v18, %v1235_v51 }
 0x6e3   :  { %v954_v9 = vpop.eup %953 }
 0x6e4   :  { %556 = vrot.lane.b32.xlu2 %v954_v9, %s974_s2 }
 0x73e   :  { %v557_v12 = vpop.permute.xlu2 %556 }
 0x73f   :  { %v559_v17 = vmul.f32 %v557_v12, %v554_v11 }
 0x741   :  { %v1377_v19 = vadd.f32 %v560_v15, %v559_v17 }
 0x743   :  { %563 = vrot.lane.b32.xlu0 %v1377_v19, %s974_s2 }
 0x7b5   :  { %v564_v21 = vpop.permute.xlu0 %563 }
 0x7b6   :  { %912 = vmatmul.msk.f32.vlgmr.msra.gmra.mxu2 %vm52_vm0, %v564_v21  ;;  %913 = vmatmul.msk.f32.vlgmr.msra.gmra.mxu3 %vm52_vm0, %v564_v21 }
 0x839   :  { %v584_v23 = vpop.f32.mrf.mxu2  ;;  %v604_v49 = vpop.f32.mrf.mxu3 }
 0x83a   :  { %v607_v29 = vadd.f32 %v584_v23, %v110_v26  ;;  %v627_v55 = vadd.f32 %v1233_v45, %v604_v49 }
 0x83c   :  { %v914_v31 = vmul.f32 -1.442695, %v607_v29  ;;  %v116_v29 = vadd.f32 %v1364_v3, %v1227_v35 }
 0x83e   :  { %955 = vpow2.f32 %v914_v31 }
 0x844   :  { %v956_v40 = vpop.eup %955 }
 0x845   :  { %v611_v41 = vadd.f32 1.0, %v956_v40 }
 0x847   :  { %957 = vrcp.f32 %v611_v41  ;;  %v623_v46 = vand.u32 2147483648, %v611_v41  ;;  %v621_v48 = vand.u32 2147483647, %v611_v41  ;;  %vm617_vm7 = vweird.f32 %v611_v41 }
 0x849   :  { %v624_v53 = vor.u32 1.1754944e-38, %v623_v46  ;;  %vm622_vm9 = vcmp.eq.f32.partialorder %v621_v48, 8.507059e+37 }
 0x84d   :  { %v958_v42 = vpop.eup %957 }
 0x84e   :  { %v613_v43 = vmul.f32 %v958_v42, %v611_v41  ;;  %vm618_vm6 = vweird.f32 %v958_v42 }
 0x84f   :  { %vm619_vm8 = vmor %vm617_vm7, %vm618_vm6 }
 0x850   :  { %v614_v44 = vsub.f32 1.0, %v613_v43 }
 0x852   :  { %v615_v47 = vmul.f32 %v958_v42, %v614_v44 }
 0x854   :  { %v616_v50 = vadd.f32 %v958_v42, %v615_v47 }
 0x856   :  { %v620_v54 = vsel %vm619_vm8, %v958_v42, %v616_v50 }
 0x857   :  { %v625_v56 = vsel %vm622_vm9, %v624_v53, %v620_v54 }
 0x858   :  { %v628_v58 = vmul.f32 %v627_v55, %v625_v56  ;;  %v631_v62 = vsub.f32 1.0, %v625_v56  ;;  %v637_v10 = vmul.f32 %v625_v56, %v1377_v19 }
 0x85a   :  { %v629_v60 = vadd.f32 %v628_v58, %v151_v57  ;;  %v157_v57 = vadd.f32 %v1371_v24, %v1235_v51 }
 0x85c   :  { %959 = vtanh.f32 %v629_v60 }
 0x862   :  { %v960_v61 = vpop.eup %959 }
 0x863   :  { %633 = vrot.lane.b32.xlu1 %v960_v61, %s974_s2 }
 0x8d5   :  { %v634_v2 = vpop.permute.xlu1 %633 }
 0x8d6   :  { %v636_v13 = vmul.f32 %v634_v2, %v631_v62 }
 0x8d8   :  { %v1389_v14 = vadd.f32 %v637_v10, %v636_v13 }
 0x8da   :  { %640 = vrot.lane.b32.xlu2 %v1389_v14, %s974_s2 }
 0x934   :  { %v641_v16 = vpop.permute.xlu2 %640 }
 0x935   :  { %915 = vmatmul.msk.f32.vlgmr.msra.gmra.mxu0 %vm52_vm0, %v641_v16  ;;  %916 = vmatmul.msk.f32.vlgmr.msra.gmra.mxu1 %vm52_vm0, %v641_v16 }
 0x9b2   :  { %v661_v20 = vpop.f32.mrf.mxu0  ;;  %v681_v39 = vpop.f32.mrf.mxu1 }
 0x9b3   :  { %v684_v22 = vadd.f32 %v661_v20, %v113_v7  ;;  %v704_v4 = vadd.f32 %v1233_v45, %v681_v39 }
 0x9b5   :  { %v917_v25 = vmul.f32 -1.442695, %v684_v22 }
 0x9b7   :  { %961 = vpow2.f32 %v917_v25 }
 0x9bd   :  { %v962_v27 = vpop.eup %961 }
 0x9be   :  { %v688_v28 = vadd.f32 1.0, %v962_v27 }
 0x9c0   :  { %963 = vrcp.f32 %v688_v28  ;;  %v700_v34 = vand.u32 2147483648, %v688_v28  ;;  %v698_v38 = vand.u32 2147483647, %v688_v28  ;;  %vm694_vm11 = vweird.f32 %v688_v28 }
 0x9c2   :  { %v701_v1 = vor.u32 1.1754944e-38, %v700_v34  ;;  %vm699_vm13 = vcmp.eq.f32.partialorder %v698_v38, 8.507059e+37 }
 0x9c6   :  { %v964_v30 = vpop.eup %963 }
 0x9c7   :  { %v690_v32 = vmul.f32 %v964_v30, %v688_v28  ;;  %vm695_vm10 = vweird.f32 %v964_v30 }
 0x9c8   :  { %vm696_vm12 = vmor %vm694_vm11, %vm695_vm10 }
 0x9c9   :  { %v691_v33 = vsub.f32 1.0, %v690_v32 }
 0x9cb   :  { %v692_v36 = vmul.f32 %v964_v30, %v691_v33 }
 0x9cd   :  { %v693_v0 = vadd.f32 %v964_v30, %v692_v36 }
 0x9cf   :  { %v697_v63 = vsel %vm696_vm12, %v964_v30, %v693_v0 }
 0x9d0   :  { %v702_v6 = vsel %vm699_vm13, %v701_v1, %v697_v63 }
 0x9d1   :  { %v705_v9 = vmul.f32 %v704_v4, %v702_v6  ;;  %v708_v15 = vsub.f32 1.0, %v702_v6  ;;  %v714_v21 = vmul.f32 %v702_v6, %v1389_v14 }
 0x9d3   :  { %v706_v11 = vadd.f32 %v705_v9, %v154_v8 }
 0x9d5   :  { %965 = vtanh.f32 %v706_v11 }
 0x9db   :  { %v966_v12 = vpop.eup %965 }
 0x9dc   :  { %710 = vrot.lane.b32.xlu0 %v966_v12, %s974_s2 }
 0x9e4   :  { %800 = vrot.lane.b32.xlu0 %v1377_v19, %s975_s0 }
 0xa4e   :  { %v711_v17 = vpop.permute.xlu0 %710 }
 0xa4f   :  { %v713_v26 = vmul.f32 %v711_v17, %v708_v15 }
 0xa51   :  { %v1404_v23 = vadd.f32 %v714_v21, %v713_v26 }
 0xa53   :  { %717 = vrot.lane.b32.xlu1 %v1404_v23, %s974_s2 }
 0xa56   :  { %v801_v62 = vpop.permute.xlu0 %800 }
 0xa57   :  { %v821_v2 = vadd.f32 %v801_v62, %v1356_v59 }
 0xa5b   :  { %796 = vrot.lane.b32.xlu1 %v1404_v23, %s975_s0 }
 0xa63   :  { %802 = vrot.lane.b32.xlu1 %v1356_v59, %s975_s0 }
 0xa6b   :  { %808 = vrot.lane.b32.xlu1 %v1240_v5, %s975_s0 }
 0xac5   :  { %v718_v18 = vpop.permute.xlu1 %717 }
 0xac6   :  { %918 = vmatmul.msk.f32.vlgmr.msrb.gmra.mxu2 %vm52_vm0, %v718_v18  ;;  %919 = vmatmul.msk.f32.vlgmr.msrb.gmra.mxu3 %vm52_vm0, %v718_v18 }
 0xacd   :  { %v797_v20 = vpop.permute.xlu1 %796 }
 0xace   :  { %v819_v25 = vadd.f32 %v797_v20, %v1272_v52 }
 0xad5   :  { %v803_v27 = vpop.permute.xlu1 %802 }
 0xb49   :  { %v738_v31 = vpop.f32.mrf.mxu2  ;;  %v758_v53 = vpop.f32.mrf.mxu3 }
 0xb4a   :  { %v761_v40 = vadd.f32 %v738_v31, %v116_v29  ;;  %v781_v3 = vadd.f32 %v1233_v45, %v758_v53 }
 0xb4c   :  { %v920_v41 = vmul.f32 -1.442695, %v761_v40 }
 0xb4e   :  { %967 = vpow2.f32 %v920_v41 }
 0xb54   :  { %v968_v42 = vpop.eup %967 }
 0xb55   :  { %v765_v43 = vadd.f32 1.0, %v968_v42 }
 0xb57   :  { %969 = vrcp.f32 %v765_v43  ;;  %v777_v48 = vand.u32 2147483648, %v765_v43  ;;  %v775_v50 = vand.u32 2147483647, %v765_v43  ;;  %vm771_vm0 = vweird.f32 %v765_v43 }
 0xb59   :  { %v778_v55 = vor.u32 1.1754944e-38, %v777_v48  ;;  %vm776_vm1 = vcmp.eq.f32.partialorder %v775_v50, 8.507059e+37 }
 0xb5d   :  { %v970_v44 = vpop.eup %969 }
 0xb5e   :  { %v767_v46 = vmul.f32 %v970_v44, %v765_v43  ;;  %vm772_vm14 = vweird.f32 %v970_v44 }
 0xb5f   :  { %vm773_vm15 = vmor %vm771_vm0, %vm772_vm14 }
 0xb60   :  { %v768_v47 = vsub.f32 1.0, %v767_v46 }
 0xb62   :  { %v769_v49 = vmul.f32 %v970_v44, %v768_v47 }
 0xb64   :  { %v770_v54 = vadd.f32 %v970_v44, %v769_v49 }
 0xb66   :  { %v774_v35 = vsel %vm773_vm15, %v970_v44, %v770_v54 }
 0xb67   :  { %v779_v56 = vsel %vm776_vm1, %v778_v55, %v774_v35 }
 0xb68   :  { %v782_v58 = vmul.f32 %v781_v3, %v779_v56  ;;  %v785_v45 = vsub.f32 1.0, %v779_v56  ;;  %v791_v51 = vmul.f32 %v779_v56, %v1404_v23 }
 0xb6a   :  { %v783_v60 = vadd.f32 %v782_v58, %v157_v57 }
 0xb6c   :  { %971 = vtanh.f32 %v783_v60 }
 0xb72   :  { %v972_v61 = vpop.eup %971 }
 0xb73   :  { %787 = vrot.lane.b32.xlu2 %v972_v61, %s974_s2 }
 0xb7b   :  { %798 = vrot.lane.b32.xlu2 %v1389_v14, %s975_s0 }
 0xb83   :  { %804 = vrot.lane.b32.xlu2 %v1304_v37, %s975_s0 }
 0xb8b   :  { %840 = vrot.lane.b32.xlu2 %v821_v2, %s974_s2 }
 0xbcd   :  { %v788_v10 = vpop.permute.xlu2 %787 }
 0xbce   :  { %v790_v24 = vmul.f32 %v788_v10, %v785_v45 }
 0xbd0   :  { %v792_v13 = vadd.f32 %v791_v51, %v790_v24 }
 0xbd2   :  { %794 = vrot.lane.b32.xlu0 %v792_v13, %s975_s0 }
 0xbd5   :  { %v799_v16 = vpop.permute.xlu2 %798 }
 0xbd6   :  { %v820_v7 = vadd.f32 %v799_v16, %v1304_v37  ;;  %v822_v37 = vadd.f32 %v803_v27, %v1377_v19 }
 0xbd8   :  { %838 = vrot.lane.b32.xlu1 %v820_v7, %s974_s2 }
 0xbda   :  { %806 = vrot.lane.b32.xlu0 %v1272_v52, %s975_s0 }
 0xbdd   :  { %v805_v59 = vpop.permute.xlu2 %804 }
 0xbde   :  { %v823_v22 = vadd.f32 %v805_v59, %v1389_v14  ;;  %v809_v14 = vpop.permute.xlu1 %808 }
 0xbdf   :  { %v825_v52 = vadd.f32 %v809_v14, %v792_v13 }
 0xbe0   :  { %844 = vrot.lane.b32.xlu1 %v823_v22, %s974_s2 }
 0xbe2   :  { %836 = vrot.lane.b32.xlu0 %v819_v25, %s974_s2 }
 0xbe5   :  { %v841_v28 = vpop.permute.xlu2 %840 }
 0xbe6   :  { %862 = vst.msk [vmem:[%s1492_s5 + $0x18] sm:$0xff] %vm858_vm2, %v841_v28 }
 0xbe8   :  { %867 = vrot.lane.b32.xlu1 %v792_v13, %s974_s2 }
 0xbea   :  { %842 = vrot.lane.b32.xlu0 %v822_v37, %s974_s2 }
 0xbf2   :  { %848 = vrot.lane.b32.xlu0 %v825_v52, %s974_s2 }
 0xc44   :  { %v795_v30 = vpop.permute.xlu0 %794 }
 0xc45   :  { %v818_v38 = vadd.f32 %v795_v30, %v1240_v5 }
 0xc4a   :  { %v839_v32 = vpop.permute.xlu1 %838 }
 0xc4b   :  { %861 = vst.msk [vmem:[%s1492_s5 + $0x10] sm:$0xff] %vm858_vm2, %v839_v32 }
 0xc4c   :  { %v807_v33 = vpop.permute.xlu0 %806 }
 0xc4d   :  { %v824_v34 = vadd.f32 %v807_v33, %v1404_v23 }
 0xc4f   :  { %846 = vrot.lane.b32.xlu2 %v824_v34, %s974_s2 }
 0xc52   :  { %v845_v19 = vpop.permute.xlu1 %844 }
 0xc53   :  { %864 = vst.msk [vmem:[%s1492_s5 + $0x28] sm:$0xff] %vm858_vm2, %v845_v19 }
 0xc54   :  { %v837_v36 = vpop.permute.xlu0 %836 }
 0xc55   :  { %860 = vst.msk [vmem:[%s1492_s5 + $0x8] sm:$0xff] %vm858_vm2, %v837_v36 }
 0xc57   :  { %834 = vrot.lane.b32.xlu2 %v818_v38, %s974_s2 }
 0xc5a   :  { %v868_v39 = vpop.permute.xlu1 %867 }
 0xc5b   :  { %873 = vst.msk [vmem:[%s1493_s6] sm:$0xff] %vm858_vm2, %v868_v39 }
 0xc5c   :  { %v843_v0 = vpop.permute.xlu0 %842 }
 0xc5d   :  { %863 = vst.msk [vmem:[%s1492_s5 + $0x20] sm:$0xff] %vm858_vm2, %v843_v0 }
 0xc5f   :  { %869 = vrot.lane.b32.xlu2 %v795_v30, %s974_s2 }
 0xc64   :  { %v849_v5 = vpop.permute.xlu0 %848 }
 0xc65   :  { %866 = vst.msk [vmem:[%s1492_s5 + $0x38] sm:$0xff] %vm858_vm2, %v849_v5 }
 0xca9   :  { %v847_v1 = vpop.permute.xlu2 %846 }
 0xcaa   :  { %865 = vst.msk [vmem:[%s1492_s5 + $0x30] sm:$0xff] %vm858_vm2, %v847_v1 }
 0xcb1   :  { %v835_v63 = vpop.permute.xlu2 %834 }
 0xcb2   :  { %859 = vst.msk [vmem:[%s1492_s5] sm:$0xff] %vm858_vm2, %v835_v63 }
 0xcb9   :  { %v870_v4 = vpop.permute.xlu2 %869 }
 0xcba   :  { %874 = vst.msk [vmem:[%s1493_s6 + $0x8] sm:$0xff] %vm858_vm2, %v870_v4 }

</bundles_post_ra>
